<compile_context>
chip_gen: v6e
topology: v6e:2x2x1
jax: 0.10.0
libtpu: 0.0.40
codegen_flags: <defaults>
</compile_context>

<pallas_src>
import jax
import jax.numpy as jnp
from jax.experimental import pallas as pl
from jax.experimental.pallas import tpu as pltpu


def _dirichlet_kernel(stats_ref, alpha_ref, eps_ref, out_ref):
    """One (TN, K) row tile: elementwise transform + row-wise softmax."""
    alpha = alpha_ref[...].astype(jnp.float32)
    eps = eps_ref[...].astype(jnp.float32)
    k = alpha.shape[-1]                       # static

    mean_log = stats_ref[0]                   # global mean(log(alpha))  (SMEM)
    sum_inv = stats_ref[1]                    # global sum(1/alpha)      (SMEM)

    mu = jnp.log(alpha) - mean_log
    inv = 1.0 / alpha                         # exact recip for the variance path
    var = inv * (1.0 - 2.0 / k) + sum_inv * (1.0 / (k * k))
    var = jnp.maximum(var, 0.0)               # guard fp round-off (and K==1 edge)
    std = jnp.sqrt(var)

    logit = eps * std + mu

    # softmax over the last dim
    m = jnp.max(logit, axis=-1, keepdims=True)
    e = jnp.exp(logit - m)
    denom = jnp.sum(e, axis=-1, keepdims=True)
    out_ref[...] = (e * pl.reciprocal(denom, approx=True)).astype(out_ref.dtype)


def _pick_row_tile(n, k):
    # ~12 live f32 (TN, K) temporaries incl. double-buffered in/out; keep the
    # tile comfortably under v7x's smaller scoped VMEM.
    budget_bytes = 16 * 1024 * 1024
    tn = budget_bytes // (k * 4 * 12)
    tn = max(8, min(tn, 1024))
    if tn >= n:
        return n                              # single full block (any N allowed)
    return (tn // 8) * 8                      # sublane-aligned row tile


@jax.jit
def sample_dirichlet(alpha, eps):
    """alpha: (N, K) positive array; eps: (N, K) standard-normal noise."""
    n, k = alpha.shape
    a32 = alpha.astype(jnp.float32)

    # Global scalar statistics: cheap mem-bound pre-pass, kept in f32.
    stats = jnp.stack(
        [jnp.mean(jnp.log(a32)), jnp.sum(1.0 / a32)]
    ).astype(jnp.float32)

    tn = _pick_row_tile(n, k)
    grid = (pl.cdiv(n, tn),)

    return pl.pallas_call(
        _dirichlet_kernel,
        out_shape=jax.ShapeDtypeStruct((n, k), alpha.dtype),
        grid=grid,
        in_specs=[
            pl.BlockSpec(memory_space=pltpu.MemorySpace.SMEM),   # stats (2,)
            pl.BlockSpec((tn, k), lambda i: (i, 0)),             # alpha row tile
            pl.BlockSpec((tn, k), lambda i: (i, 0)),             # eps row tile
        ],
        out_specs=pl.BlockSpec((tn, k), lambda i: (i, 0)),
        compiler_params=pltpu.CompilerParams(
            dimension_semantics=("parallel",),                   # megacore on v7x
        ),
        cost_estimate=pl.CostEstimate(
            flops=10 * n * k,
            transcendentals=5 * n * k,
            bytes_accessed=3 * n * k * 4,
        ),
    )(stats, alpha, eps)


if __name__ == "__main__":
    key = jax.random.PRNGKey(0)
    k_alpha, k_eps = jax.random.split(key)

    # small shape consistent with the module: batch N=8, classes K=128
    N, K = 8, 128
    alpha = jax.random.uniform(k_alpha, (N, K), dtype=jnp.float32,
                               minval=0.5, maxval=2.0)
    # TODO(synk): torch.randn_like is replaced by jax.random.normal in the
    # wrapper (TPU hardware PRNG primitives have no CPU/interpret lowering).
    eps = jax.random.normal(k_eps, (N, K), dtype=jnp.float32)

    out = jax.block_until_ready(sample_dirichlet(alpha, eps))

    # plain-jnp reference with the same eps
    a32 = alpha.astype(jnp.float32)
    mu = jnp.log(a32) - jnp.mean(jnp.log(a32))
    sum_inv = jnp.sum(1.0 / a32)
    std = jnp.sqrt((1.0 / a32) * (1.0 - 2.0 / K) + sum_inv / (K * K))
    ref = jax.nn.softmax(eps * std + mu, axis=-1)

    assert out.shape == alpha.shape
    assert bool(jnp.all(jnp.isfinite(out)))
    # approx reciprocal in the softmax denominator perturbs normalization by
    # up to ~0.4%, so use loose tolerances.
    assert bool(jnp.allclose(jnp.sum(out, axis=-1), 1.0, atol=2e-2))
    assert bool(jnp.allclose(out, ref, atol=5e-3, rtol=2e-2))

    print("KERNEL_OK")
</pallas_src>

<mosaic_0001>
module attributes {stable_mosaic.version = 11 : i64} {
  func.func @_dirichlet_kernel(%arg0: i32, %arg1: memref<2xf32, #tpu.memory_space<smem>>, %arg2: memref<8x128xf32, #tpu.memory_space<vmem>>, %arg3: memref<8x128xf32, #tpu.memory_space<vmem>>, %arg4: memref<8x128xf32, #tpu.memory_space<vmem>>) attributes {dimension_semantics = [#tpu.dimension_semantics<parallel>], iteration_bounds = array<i64: 1>, scalar_prefetch = 0 : i64, scratch_operands = 0 : i64, tpu.core_type = #tpu.core_type<tc>, window_params = [{transform_indices = @transform_0, window_bounds = array<i64: 2>}, {transform_indices = @transform_1, window_bounds = array<i64: 8, 128>}, {transform_indices = @transform_2, window_bounds = array<i64: 8, 128>}, {transform_indices = @transform_3, window_bounds = array<i64: 8, 128>}]} {
    %c0 = arith.constant 0 : index
    %c0_0 = arith.constant 0 : index
    %0 = vector.load %arg2[%c0, %c0_0] : memref<8x128xf32, #tpu.memory_space<vmem>>, vector<8x128xf32>
    %c0_1 = arith.constant 0 : index
    %c0_2 = arith.constant 0 : index
    %1 = vector.load %arg3[%c0_1, %c0_2] : memref<8x128xf32, #tpu.memory_space<vmem>>, vector<8x128xf32>
    %c0_3 = arith.constant 0 : index
    %2 = memref.load %arg1[%c0_3] : memref<2xf32, #tpu.memory_space<smem>>
    %c1 = arith.constant 1 : index
    %3 = memref.load %arg1[%c1] : memref<2xf32, #tpu.memory_space<smem>>
    %4 = math.log %0 : vector<8x128xf32>
    %5 = vector.broadcast %2 : f32 to vector<8x128xf32>
    %6 = arith.subf %4, %5 : vector<8x128xf32>
    %cst = arith.constant 1.000000e+00 : f32
    %7 = vector.broadcast %cst : f32 to vector<8x128xf32>
    %8 = arith.divf %7, %0 : vector<8x128xf32>
    %cst_4 = arith.constant 9.843750e-01 : f32
    %9 = vector.broadcast %cst_4 : f32 to vector<8x128xf32>
    %10 = arith.mulf %8, %9 : vector<8x128xf32>
    %cst_5 = arith.constant 6.10351563E-5 : f32
    %11 = arith.mulf %3, %cst_5 : f32
    %12 = vector.broadcast %11 : f32 to vector<8x128xf32>
    %13 = arith.addf %10, %12 : vector<8x128xf32>
    %cst_6 = arith.constant 0.000000e+00 : f32
    %14 = vector.broadcast %cst_6 : f32 to vector<8x128xf32>
    %15 = arith.maximumf %13, %14 : vector<8x128xf32>
    %16 = math.sqrt %15 : vector<8x128xf32>
    %17 = arith.mulf %1, %16 : vector<8x128xf32>
    %18 = arith.addf %17, %6 : vector<8x128xf32>
    %cst_7 = arith.constant dense<0xFF800000> : vector<8xf32>
    %19 = vector.multi_reduction <maximumf>, %18, %cst_7 [1] : vector<8x128xf32> to vector<8xf32>
    %20 = vector.shape_cast %19 : vector<8xf32> to vector<8x1xf32>
    %21 = vector.broadcast %20 : vector<8x1xf32> to vector<8x128xf32>
    %22 = arith.subf %18, %21 : vector<8x128xf32>
    %23 = math.exp %22 : vector<8x128xf32>
    %cst_8 = arith.constant dense<0.000000e+00> : vector<8xf32>
    %24 = vector.multi_reduction <add>, %23, %cst_8 [1] : vector<8x128xf32> to vector<8xf32>
    %25 = vector.shape_cast %24 : vector<8xf32> to vector<8x1xf32>
    %26 = tpu.reciprocal %25 {approx = true} : vector<8x1xf32> -> vector<8x1xf32>
    %27 = vector.broadcast %26 : vector<8x1xf32> to vector<8x128xf32>
    %28 = arith.mulf %23, %27 : vector<8x128xf32>
    %c0_9 = arith.constant 0 : index
    %c0_10 = arith.constant 0 : index
    %29 = vector.load %arg4[%c0_9, %c0_10] : memref<8x128xf32, #tpu.memory_space<vmem>>, vector<8x128xf32>
    tpu.vector_store %arg4[%c0_9, %c0_10], %28 {strides = array<i32>} : memref<8x128xf32, #tpu.memory_space<vmem>>, vector<8x128xf32>,
    return
  }
  func.func @transform_0(%arg0: i32) -> i32 {
    %c0_i32 = arith.constant 0 : i32
    %c0_i32_0 = arith.constant 0 : i32
    return %c0_i32 : i32
  }
  func.func @transform_1(%arg0: i32) -> (i32, i32) {
    %c0_i32 = arith.constant 0 : i32
    %c0_i32_0 = arith.constant 0 : i32
    return %arg0, %c0_i32 : i32, i32
  }
  func.func @transform_2(%arg0: i32) -> (i32, i32) {
    %c0_i32 = arith.constant 0 : i32
    %c0_i32_0 = arith.constant 0 : i32
    return %arg0, %c0_i32 : i32, i32
  }
  func.func @transform_3(%arg0: i32) -> (i32, i32) {
    %c0_i32 = arith.constant 0 : i32
    %c0_i32_0 = arith.constant 0 : i32
    return %arg0, %c0_i32 : i32, i32
  }
}

</mosaic_0001>

<bundles_post_ra>
// kernel: sample_dirichlet.1
= control target key start
LH: loop header
LB: loop body
LE: loop exit
PB: predicated region body
PF: predicated region fallthrough
CT: control target
= control target key end

     0   :  { %8 = vsyncpa [#allocation4], 0  ;;  %s160_s0 = inlined_call_operand.vmem [shape: f32[2], index: 0, kind: input, shape index: {}]   ;;  %s161_s1 = inlined_call_operand.vmem [shape: f32[8,128], index: 1, kind: input, shape index: {}]   ;;  %s162_s2 = inlined_call_operand.vmem [shape: f32[8,128], index: 2, kind: input, shape index: {}]   ;;  %s163_s3 = inlined_call_operand.hbm [shape: f32[8,128], index: 3, kind: output, shape index: {}]  }
   0x1   :  { %9 = vsyncpa [#allocation3], 0  ;;  %s16_s14 = sshll.u32 %s160_s0, 4  ;;  %s17_s14 = int_to_ptr.vmem [resolvable:$true] %s16_s14 }
   0x2   :  { %s90_s15 = scalar_lea.vmem %s17_s14, 16  ;;  %p95_p1 = scmp.lt.s32.totalorder %s17_s14, %s17_s14 }
   0x3   :  { %p91_p0 = scmp.ne.s32.totalorder %s17_s14, %s90_s15  ;;  %p96_p2 = scmp.lt.s32.totalorder %s90_s15, %s90_s15 }
   0x5   :  { %p97_p3 = por %p96_p2, %p95_p1 }
   0x7   :  { %p98_p4 = pnand %p97_p3, %p91_p0 }
   0x9   :  { %101 = shalt.err (!%p98_p4)
}
   0xa   :  { %s126_s16 = smov [#allocation2]  }
   0xb   :  { %19 = dma.vmem_to_smem %s17_s14, 16, %s126_s16, [#allocation4]  }
   0xc   :  { %122 = dma.done.wait [#allocation4], 16  }
   0xd   :  { %123 = vsyncadd [#allocation4], 4294967280 }
   0xe   :  { %27 = sfence }
   0xf   :  { %v28_v0 = vld [vmem:[%s161_s1] sm:$0xff]  ;;  %s77_s19 = sld [smem:[#allocation2 + $0x1]]  ;;  %s127_s22 = smov [#allocation5]  }
  0x10   :  { %80 = vrcp.f32 %v28_v0  ;;  %s30_s20 = sld [smem:[#allocation2]]  ;;  %v29_v12 = vld [vmem:[%s162_s2] sm:$0xff]  ;;  %s68_s23 = sshll.u32 %s127_s22, 4  ;;  %s69_s23 = int_to_ptr.vmem [resolvable:$true] %s68_s23 }
  0x11   :  { %82 = vlog2.f32 %v28_v0  ;;  %s102_s2 = scalar_lea.vmem %s69_s23, 128  ;;  %p107_p6 = scmp.lt.s32.totalorder %s69_s23, %s69_s23 }
  0x12   :  { %p103_p5 = scmp.ne.s32.totalorder %s69_s23, %s102_s2  ;;  %p108_p7 = scmp.lt.s32.totalorder %s102_s2, %s102_s2 }
  0x14   :  { %p109_p8 = por %p108_p7, %p107_p6 }
  0x15   :  { %s39_s0 = smul.f32 6.1035156e-05, %s77_s19 }
  0x16   :  { %v34_v9 = vstv %s30_s20  ;;  %p110_p9 = pnand %p109_p8, %p103_p5 }
  0x17   :  { %v40_v2 = vstv %s39_s0 }
  0x1d   :  { %v81_v1 = vpop.eup %80 }
  0x1e   :  { %v38_v3 = vmul.f32 0.984375, %v81_v1  ;;  %v83_v6 = vpop.eup %82 }
  0x1f   :  { %v33_v7 = vmul.f32 0.6931472, %v83_v6 }
  0x20   :  { %v41_v4 = vadd.f32 %v40_v2, %v38_v3 }
  0x21   :  { %v35_v13 = vsub.f32 %v33_v7, %v34_v9 }
  0x22   :  { %v42_v5 = vmax.f32 %v41_v4, 0.0 }
  0x24   :  { %84 = vrsqrt.f32 %v42_v5  ;;  %vm45_vm0 = vcmp.eq.f32.partialorder %v42_v5, inf  ;;  %v48_v10 = vand.u32 2147483648, %v42_v5  ;;  %vm47_vm1 = vcmp.eq.f32.partialorder %v42_v5, 0.0 }
  0x31   :  { %v85_v8 = vpop.eup %84 }
  0x32   :  { %v44_v11 = vmul.f32 %v85_v8, %v42_v5 }
  0x34   :  { %v46_v14 = vsel %vm45_vm0, %v42_v5, %v44_v11 }
  0x35   :  { %v49_v15 = vsel %vm47_vm1, %v48_v10, %v46_v14 }
  0x36   :  { %v50_v16 = vmul.f32 %v49_v15, %v29_v12 }
  0x38   :  { %v51_v17 = vadd.f32 %v50_v16, %v35_v13 }
  0x3a   :  { %52 = vmax.xlane.f32.xlu0 %v51_v17 }
  0xc3   :  { %v53_v18 = vpop.xlane.xlu0 %52 }
  0xc4   :  { %v54_v19 = vsub.f32 %v51_v17, %v53_v18 }
  0xc6   :  { %v55_v20 = vmul.f32 1.442695, %v54_v19 }
  0xc8   :  { %86 = vpow2.f32 %v55_v20 }
  0xd5   :  { %v87_v21 = vpop.eup %86 }
  0xd6   :  { %57 = vadd.xlane.f32.xlu0 %v87_v21 }
 0x15f   :  { %v58_v22 = vpop.xlane.xlu0 %57 }
 0x160   :  { %88 = vrcp.f32 %v58_v22 }
 0x16d   :  { %v89_v23 = vpop.eup %88 }
 0x16e   :  { %v60_v24 = vmul.f32 %v89_v23, %v87_v21 }
 0x170   :  { %61 = vst [vmem:[#allocation5] sm:$0xff] %v60_v24 }
 0x171   :  { %113 = shalt.err (!%p110_p9)
}
 0x172   :  { %71 = dma.vmem_to_hbm [thread:$0]  %s69_s23, 128, %s163_s3, [#allocation3]  }
 0x173   :  { %124 = dma.done.wait [#allocation3], 128  }
 0x174   :  { %125 = vsyncadd [#allocation3], 4294967168 }
 0x175   :  { %75 = vsyncpa [#allocation3], 1 }
 0x176   :  { %76 = vsyncpa [#allocation4], 1 }

</bundles_post_ra>
